<compile_context>
chip_gen: v7x
topology: tpu7x:2x2x1
jax: 0.10.0
libtpu: 0.0.40
codegen_flags: <defaults>
</compile_context>

<pallas_src>
import functools

import jax
import jax.numpy as jnp
from jax import lax
from jax.experimental import pallas as pl
from jax.experimental.pallas import tpu as pltpu


# ---------------------------------------------------------------------------
# helpers
# ---------------------------------------------------------------------------
def _round_up(x, m):
    return ((x + m - 1) // m) * m


def _pick_tile(total, cap, mult=8):
    """Largest multiple of `mult` that divides `total` and is <= cap."""
    best = mult
    t = mult
    while t <= min(cap, total):
        if total % t == 0:
            best = t
        t += mult
    return best


def _pad2(w, rows, cols):
    return jnp.pad(w, ((0, rows - w.shape[0]), (0, cols - w.shape[1])))


def _pad_vec(v, n):
    return jnp.pad(v, (0, n - v.shape[0])).reshape(1, n).astype(jnp.float32)


# ---------------------------------------------------------------------------
# Pass A: tiled Linear on the MXU + per-channel sum / sum-of-squares
# ---------------------------------------------------------------------------
def _linear_stats_kernel(x_ref, w_ref, b_ref, y_ref, sum_ref, sq_ref, *,
                         tile_m, bn_pad, bn_valid, needs_mask):
    i = pl.program_id(0)

    # bf16 operands straight into the MXU, f32 accumulation.
    y = jnp.dot(x_ref[...], w_ref[...],
                preferred_element_type=jnp.float32) + b_ref[...]
    y_ref[...] = y.astype(y_ref.dtype)

    @pl.when(i == 0)
    def _():
        sum_ref[...] = jnp.zeros_like(sum_ref)
        sq_ref[...] = jnp.zeros_like(sq_ref)

    if needs_mask:
        # Exclude token-padding rows from the BatchNorm batch statistics.
        row0 = i * tile_m
        ids = row0 + lax.broadcasted_iota(jnp.int32, (tile_m, 1), 0)
        valid = (lax.rem(ids, bn_pad) < bn_valid).astype(jnp.float32)
        y_masked = y * valid
        sum_ref[...] += jnp.sum(y_masked, axis=0, keepdims=True)
        sq_ref[...] += jnp.sum(y_masked * y, axis=0, keepdims=True)
    else:
        sum_ref[...] += jnp.sum(y, axis=0, keepdims=True)
        sq_ref[...] += jnp.sum(y * y, axis=0, keepdims=True)


# ---------------------------------------------------------------------------
# Pass B: fused BN scale/shift + multi-step LIF (static unrolled T loop)
# ---------------------------------------------------------------------------
def _bn_lif_kernel(y_ref, scale_ref, shift_ref, o_ref, *,
                   n_steps, inv_tau, v_threshold):
    scale = scale_ref[...]                       # (1, C)  f32
    shift = shift_ref[...]                       # (1, C)  f32
    v = jnp.zeros(o_ref.shape[1:], jnp.float32)  # membrane potential, f32
    for t in range(n_steps):                     # T small & static -> unrolled
        yt = y_ref[t].astype(jnp.float32) * scale + shift
        v = v + (yt - v) * inv_tau
        spike = (v >= v_threshold).astype(jnp.float32)
        v = v * (1.0 - spike)                    # hard reset to v_reset = 0
        o_ref[t] = spike.astype(o_ref.dtype)


# ---------------------------------------------------------------------------
# One fc -> BN -> LIF stage
# ---------------------------------------------------------------------------
def mlp_stage(x, w, b, gamma, beta, *, bn_valid,
              eps=1e-5, tau=2.0, v_threshold=1.0):
    """x: (T, BN_pad, Cin_pad) bf16 -> (T, BN_pad, Cout_pad) bf16 spikes."""
    T, bn_pad, cin = x.shape
    cout = w.shape[1]
    m_rows = T * bn_pad
    needs_mask = bn_pad != bn_valid
    vmem_limit = 48 * 1024 * 1024   # headroom under v7x's 64 MiB physical VMEM

    # ---- pass A: tiled matmul + BN statistics -----------------------------
    tile_m = _pick_tile(m_rows, cap=512)
    kernel_a = functools.partial(
        _linear_stats_kernel, tile_m=tile_m, bn_pad=bn_pad,
        bn_valid=bn_valid, needs_mask=needs_mask)

    y, s, sq = pl.pallas_call(
        kernel_a,
        out_shape=(
            jax.ShapeDtypeStruct((m_rows, cout), jnp.bfloat16),
            jax.ShapeDtypeStruct((1, cout), jnp.float32),
            jax.ShapeDtypeStruct((1, cout), jnp.float32),
        ),
        grid=(m_rows // tile_m,),
        in_specs=[
            pl.BlockSpec((tile_m, cin), lambda i: (i, 0)),
            pl.BlockSpec((cin, cout), lambda i: (0, 0)),
            pl.BlockSpec((1, cout), lambda i: (0, 0)),
        ],
        out_specs=(
            pl.BlockSpec((tile_m, cout), lambda i: (i, 0)),
            pl.BlockSpec((1, cout), lambda i: (0, 0)),
            pl.BlockSpec((1, cout), lambda i: (0, 0)),
        ),
        compiler_params=pltpu.CompilerParams(
            dimension_semantics=("arbitrary",),     # accumulators live across tiles
            vmem_limit_bytes=vmem_limit),
        cost_estimate=pl.CostEstimate(
            flops=2 * m_rows * cin * cout,
            transcendentals=0,
            bytes_accessed=(m_rows * cin * 2 + cin * cout * 2
                            + m_rows * cout * 2 + 3 * cout * 4)),
    )(x.reshape(m_rows, cin), w, b)

    # ---- fold BN into a single per-channel scale/shift (tiny, f32) --------
    count = float(T * bn_valid)
    mean = s / count
    var = jnp.maximum(sq / count - mean * mean, 0.0)   # biased (training) variance
    scale = gamma * lax.rsqrt(var + eps)
    shift = beta - mean * scale

    # ---- pass B: normalize + multi-step LIF, tiled over tokens ------------
    tile_cap = max(8, min(512, (4 * 1024 * 1024) // max(1, T * cout * 4)))
    tile_r = _pick_tile(bn_pad, cap=tile_cap)
    kernel_b = functools.partial(
        _bn_lif_kernel, n_steps=T, inv_tau=1.0 / tau, v_threshold=v_threshold)

    spikes = pl.pallas_call(
        kernel_b,
        out_shape=jax.ShapeDtypeStruct((T, bn_pad, cout), jnp.bfloat16),
        grid=(bn_pad // tile_r,),
        in_specs=[
            pl.BlockSpec((T, tile_r, cout), lambda i: (0, i, 0)),
            pl.BlockSpec((1, cout), lambda i: (0, 0)),
            pl.BlockSpec((1, cout), lambda i: (0, 0)),
        ],
        out_specs=pl.BlockSpec((T, tile_r, cout), lambda i: (0, i, 0)),
        compiler_params=pltpu.CompilerParams(
            dimension_semantics=("parallel",),      # independent token tiles
            vmem_limit_bytes=vmem_limit),
        cost_estimate=pl.CostEstimate(
            flops=6 * T * bn_pad * cout,
            transcendentals=0,
            bytes_accessed=2 * T * bn_pad * cout * 2 + 2 * cout * 4),
    )(y.reshape(T, bn_pad, cout), scale, shift)

    return spikes


# ---------------------------------------------------------------------------
# Full MLP forward
# ---------------------------------------------------------------------------
def mlp_forward(x, params, *, eps=1e-5, tau=2.0, v_threshold=1.0):
    """x: (T, B, N, C) float32 -> (T, B, N, C) binary-spike float32."""
    T, B, N, C = x.shape
    hidden = params["w1"].shape[1]

    bn = B * N
    bn_pad = _round_up(bn, 8)        # sublane-aligned token rows
    c_pad = _round_up(C, 128)        # lane-dense channels
    h_pad = _round_up(hidden, 128)

    # bf16 transport, zero-padded channels / token rows.
    x_flat = x.reshape(T, bn, C)
    x_flat = jnp.pad(x_flat, ((0, 0), (0, bn_pad - bn), (0, c_pad - C)))
    x_flat = x_flat.astype(jnp.bfloat16)

    w1 = _pad2(params["w1"], c_pad, h_pad).astype(jnp.bfloat16)
    b1 = _pad_vec(params["b1"], h_pad)
    g1 = _pad_vec(params["g1"], h_pad)    # padded channels: gamma = 0 -> no spikes
    be1 = _pad_vec(params["be1"], h_pad)
    w2 = _pad2(params["w2"], h_pad, c_pad).astype(jnp.bfloat16)
    b2 = _pad_vec(params["b2"], c_pad)
    g2 = _pad_vec(params["g2"], c_pad)
    be2 = _pad_vec(params["be2"], c_pad)

    h = mlp_stage(x_flat, w1, b1, g1, be1, bn_valid=bn,
                  eps=eps, tau=tau, v_threshold=v_threshold)
    out = mlp_stage(h, w2, b2, g2, be2, bn_valid=bn,
                    eps=eps, tau=tau, v_threshold=v_threshold)

    out = out[:, :bn, :C].astype(jnp.float32)
    return out.reshape(T, B, N, C)


def init_params(key, in_features, hidden_features):
    k1, k2, k3, k4 = jax.random.split(key, 4)
    bound1 = 1.0 / (in_features ** 0.5)
    bound2 = 1.0 / (hidden_features ** 0.5)
    return {
        # Linear weights stored (Cin, Cout) == PyTorch weight.T
        "w1": jax.random.uniform(k1, (in_features, hidden_features),
                                 jnp.float32, -bound1, bound1),
        "b1": jax.random.uniform(k2, (hidden_features,), jnp.float32, -bound1, bound1),
        "g1": jnp.ones((hidden_features,), jnp.float32),
        "be1": jnp.zeros((hidden_features,), jnp.float32),
        "w2": jax.random.uniform(k3, (hidden_features, in_features),
                                 jnp.float32, -bound2, bound2),
        "b2": jax.random.uniform(k4, (in_features,), jnp.float32, -bound2, bound2),
        "g2": jnp.ones((in_features,), jnp.float32),
        "be2": jnp.zeros((in_features,), jnp.float32),
    }


if __name__ == "__main__":
    T, B, N, C = 4, 2, 8, 32      # time steps, batch, tokens, channels
    hidden = 64

    key = jax.random.PRNGKey(0)
    kx, kp = jax.random.split(key)
    x = jax.random.normal(kx, (T, B, N, C), jnp.float32)
    params = init_params(kp, C, hidden)

    out = jax.jit(mlp_forward)(x, params)
    out = jax.block_until_ready(out)

    assert out.shape == (T, B, N, C)
    assert bool(jnp.all((out == 0.0) | (out == 1.0)))   # LIF output is binary spikes
    print("KERNEL_OK")
</pallas_src>

<mosaic_0001>
module attributes {stable_mosaic.version = 11 : i64} {
  func.func @_bn_lif_kernel(%arg0: i32, %arg1: memref<4x16x128xbf16, #tpu.memory_space<vmem>>, %arg2: memref<1x128xf32, #tpu.memory_space<vmem>>, %arg3: memref<1x128xf32, #tpu.memory_space<vmem>>, %arg4: memref<4x16x128xbf16, #tpu.memory_space<vmem>>) attributes {dimension_semantics = [#tpu.dimension_semantics<parallel>], iteration_bounds = array<i64: 1>, scalar_prefetch = 0 : i64, scratch_operands = 0 : i64, tpu.core_type = #tpu.core_type<tc>, window_params = [{transform_indices = @transform_0, window_bounds = array<i64: 4, 16, 128>}, {pipeline_mode = #tpu.pipeline_mode<synchronous>, transform_indices = @transform_1, window_bounds = array<i64: 1, 128>}, {pipeline_mode = #tpu.pipeline_mode<synchronous>, transform_indices = @transform_2, window_bounds = array<i64: 1, 128>}, {transform_indices = @transform_3, window_bounds = array<i64: 4, 16, 128>}]} {
    %c0 = arith.constant 0 : index
    %c0_0 = arith.constant 0 : index
    %0 = vector.load %arg2[%c0, %c0_0] : memref<1x128xf32, #tpu.memory_space<vmem>>, vector<1x128xf32>
    %c0_1 = arith.constant 0 : index
    %c0_2 = arith.constant 0 : index
    %1 = vector.load %arg3[%c0_1, %c0_2] : memref<1x128xf32, #tpu.memory_space<vmem>>, vector<1x128xf32>
    %cst = arith.constant 0.000000e+00 : f32
    %2 = vector.broadcast %cst : f32 to vector<16x128xf32>
    %c0_3 = arith.constant 0 : index
    %c0_4 = arith.constant 0 : index
    %c0_5 = arith.constant 0 : index
    %3 = vector.load %arg1[%c0_3, %c0_4, %c0_5] : memref<4x16x128xbf16, #tpu.memory_space<vmem>>, vector<1x16x128xbf16>
    %4 = vector.shape_cast %3 : vector<1x16x128xbf16> to vector<16x128xbf16>
    %5 = arith.extf %4 : vector<16x128xbf16> to vector<16x128xf32>
    %6 = vector.broadcast %0 : vector<1x128xf32> to vector<16x128xf32>
    %7 = arith.mulf %5, %6 : vector<16x128xf32>
    %8 = vector.broadcast %1 : vector<1x128xf32> to vector<16x128xf32>
    %9 = arith.addf %7, %8 : vector<16x128xf32>
    %10 = arith.subf %9, %2 : vector<16x128xf32>
    %cst_6 = arith.constant 5.000000e-01 : f32
    %11 = vector.broadcast %cst_6 : f32 to vector<16x128xf32>
    %12 = arith.mulf %10, %11 : vector<16x128xf32>
    %13 = arith.addf %2, %12 : vector<16x128xf32>
    %cst_7 = arith.constant 1.000000e+00 : f32
    %14 = vector.broadcast %cst_7 : f32 to vector<16x128xf32>
    %15 = arith.cmpf oge, %13, %14 : vector<16x128xf32>
    %16 = arith.extui %15 : vector<16x128xi1> to vector<16x128xi32>
    %17 = arith.sitofp %16 : vector<16x128xi32> to vector<16x128xf32>
    %cst_8 = arith.constant 1.000000e+00 : f32
    %18 = vector.broadcast %cst_8 : f32 to vector<16x128xf32>
    %19 = arith.subf %18, %17 : vector<16x128xf32>
    %20 = arith.mulf %13, %19 : vector<16x128xf32>
    %21 = arith.truncf %17 : vector<16x128xf32> to vector<16x128xbf16>
    %c0_9 = arith.constant 0 : index
    %c0_10 = arith.constant 0 : index
    %c0_11 = arith.constant 0 : index
    %22 = vector.load %arg4[%c0_9, %c0_10, %c0_11] : memref<4x16x128xbf16, #tpu.memory_space<vmem>>, vector<1x16x128xbf16>
    %23 = vector.shape_cast %22 : vector<1x16x128xbf16> to vector<16x128xbf16>
    %24 = vector.shape_cast %21 : vector<16x128xbf16> to vector<1x16x128xbf16>
    tpu.vector_store %arg4[%c0_9, %c0_10, %c0_11], %24 {strides = array<i32>} : memref<4x16x128xbf16, #tpu.memory_space<vmem>>, vector<1x16x128xbf16>,
    %c1 = arith.constant 1 : index
    %c0_12 = arith.constant 0 : index
    %c0_13 = arith.constant 0 : index
    %25 = vector.load %arg1[%c1, %c0_12, %c0_13] : memref<4x16x128xbf16, #tpu.memory_space<vmem>>, vector<1x16x128xbf16>
    %26 = vector.shape_cast %25 : vector<1x16x128xbf16> to vector<16x128xbf16>
    %27 = arith.extf %26 : vector<16x128xbf16> to vector<16x128xf32>
    %28 = vector.broadcast %0 : vector<1x128xf32> to vector<16x128xf32>
    %29 = arith.mulf %27, %28 : vector<16x128xf32>
    %30 = vector.broadcast %1 : vector<1x128xf32> to vector<16x128xf32>
    %31 = arith.addf %29, %30 : vector<16x128xf32>
    %32 = arith.subf %31, %20 : vector<16x128xf32>
    %cst_14 = arith.constant 5.000000e-01 : f32
    %33 = vector.broadcast %cst_14 : f32 to vector<16x128xf32>
    %34 = arith.mulf %32, %33 : vector<16x128xf32>
    %35 = arith.addf %20, %34 : vector<16x128xf32>
    %cst_15 = arith.constant 1.000000e+00 : f32
    %36 = vector.broadcast %cst_15 : f32 to vector<16x128xf32>
    %37 = arith.cmpf oge, %35, %36 : vector<16x128xf32>
    %38 = arith.extui %37 : vector<16x128xi1> to vector<16x128xi32>
    %39 = arith.sitofp %38 : vector<16x128xi32> to vector<16x128xf32>
    %cst_16 = arith.constant 1.000000e+00 : f32
    %40 = vector.broadcast %cst_16 : f32 to vector<16x128xf32>
    %41 = arith.subf %40, %39 : vector<16x128xf32>
    %42 = arith.mulf %35, %41 : vector<16x128xf32>
    %43 = arith.truncf %39 : vector<16x128xf32> to vector<16x128xbf16>
    %c1_17 = arith.constant 1 : index
    %c0_18 = arith.constant 0 : index
    %c0_19 = arith.constant 0 : index
    %44 = vector.load %arg4[%c1_17, %c0_18, %c0_19] : memref<4x16x128xbf16, #tpu.memory_space<vmem>>, vector<1x16x128xbf16>
    %45 = vector.shape_cast %44 : vector<1x16x128xbf16> to vector<16x128xbf16>
    %46 = vector.shape_cast %43 : vector<16x128xbf16> to vector<1x16x128xbf16>
    tpu.vector_store %arg4[%c1_17, %c0_18, %c0_19], %46 {strides = array<i32>} : memref<4x16x128xbf16, #tpu.memory_space<vmem>>, vector<1x16x128xbf16>,
    %c2 = arith.constant 2 : index
    %c0_20 = arith.constant 0 : index
    %c0_21 = arith.constant 0 : index
    %47 = vector.load %arg1[%c2, %c0_20, %c0_21] : memref<4x16x128xbf16, #tpu.memory_space<vmem>>, vector<1x16x128xbf16>
    %48 = vector.shape_cast %47 : vector<1x16x128xbf16> to vector<16x128xbf16>
    %49 = arith.extf %48 : vector<16x128xbf16> to vector<16x128xf32>
    %50 = vector.broadcast %0 : vector<1x128xf32> to vector<16x128xf32>
    %51 = arith.mulf %49, %50 : vector<16x128xf32>
    %52 = vector.broadcast %1 : vector<1x128xf32> to vector<16x128xf32>
    %53 = arith.addf %51, %52 : vector<16x128xf32>
    %54 = arith.subf %53, %42 : vector<16x128xf32>
    %cst_22 = arith.constant 5.000000e-01 : f32
    %55 = vector.broadcast %cst_22 : f32 to vector<16x128xf32>
    %56 = arith.mulf %54, %55 : vector<16x128xf32>
    %57 = arith.addf %42, %56 : vector<16x128xf32>
    %cst_23 = arith.constant 1.000000e+00 : f32
    %58 = vector.broadcast %cst_23 : f32 to vector<16x128xf32>
    %59 = arith.cmpf oge, %57, %58 : vector<16x128xf32>
    %60 = arith.extui %59 : vector<16x128xi1> to vector<16x128xi32>
    %61 = arith.sitofp %60 : vector<16x128xi32> to vector<16x128xf32>
    %cst_24 = arith.constant 1.000000e+00 : f32
    %62 = vector.broadcast %cst_24 : f32 to vector<16x128xf32>
    %63 = arith.subf %62, %61 : vector<16x128xf32>
    %64 = arith.mulf %57, %63 : vector<16x128xf32>
    %65 = arith.truncf %61 : vector<16x128xf32> to vector<16x128xbf16>
    %c2_25 = arith.constant 2 : index
    %c0_26 = arith.constant 0 : index
    %c0_27 = arith.constant 0 : index
    %66 = vector.load %arg4[%c2_25, %c0_26, %c0_27] : memref<4x16x128xbf16, #tpu.memory_space<vmem>>, vector<1x16x128xbf16>
    %67 = vector.shape_cast %66 : vector<1x16x128xbf16> to vector<16x128xbf16>
    %68 = vector.shape_cast %65 : vector<16x128xbf16> to vector<1x16x128xbf16>
    tpu.vector_store %arg4[%c2_25, %c0_26, %c0_27], %68 {strides = array<i32>} : memref<4x16x128xbf16, #tpu.memory_space<vmem>>, vector<1x16x128xbf16>,
    %c3 = arith.constant 3 : index
    %c0_28 = arith.constant 0 : index
    %c0_29 = arith.constant 0 : index
    %69 = vector.load %arg1[%c3, %c0_28, %c0_29] : memref<4x16x128xbf16, #tpu.memory_space<vmem>>, vector<1x16x128xbf16>
    %70 = vector.shape_cast %69 : vector<1x16x128xbf16> to vector<16x128xbf16>
    %71 = arith.extf %70 : vector<16x128xbf16> to vector<16x128xf32>
    %72 = vector.broadcast %0 : vector<1x128xf32> to vector<16x128xf32>
    %73 = arith.mulf %71, %72 : vector<16x128xf32>
    %74 = vector.broadcast %1 : vector<1x128xf32> to vector<16x128xf32>
    %75 = arith.addf %73, %74 : vector<16x128xf32>
    %76 = arith.subf %75, %64 : vector<16x128xf32>
    %cst_30 = arith.constant 5.000000e-01 : f32
    %77 = vector.broadcast %cst_30 : f32 to vector<16x128xf32>
    %78 = arith.mulf %76, %77 : vector<16x128xf32>
    %79 = arith.addf %64, %78 : vector<16x128xf32>
    %cst_31 = arith.constant 1.000000e+00 : f32
    %80 = vector.broadcast %cst_31 : f32 to vector<16x128xf32>
    %81 = arith.cmpf oge, %79, %80 : vector<16x128xf32>
    %82 = arith.extui %81 : vector<16x128xi1> to vector<16x128xi32>
    %83 = arith.sitofp %82 : vector<16x128xi32> to vector<16x128xf32>
    %84 = arith.truncf %83 : vector<16x128xf32> to vector<16x128xbf16>
    %c3_32 = arith.constant 3 : index
    %c0_33 = arith.constant 0 : index
    %c0_34 = arith.constant 0 : index
    %85 = vector.load %arg4[%c3_32, %c0_33, %c0_34] : memref<4x16x128xbf16, #tpu.memory_space<vmem>>, vector<1x16x128xbf16>
    %86 = vector.shape_cast %85 : vector<1x16x128xbf16> to vector<16x128xbf16>
    %87 = vector.shape_cast %84 : vector<16x128xbf16> to vector<1x16x128xbf16>
    tpu.vector_store %arg4[%c3_32, %c0_33, %c0_34], %87 {strides = array<i32>} : memref<4x16x128xbf16, #tpu.memory_space<vmem>>, vector<1x16x128xbf16>,
    return
  }
  func.func @transform_0(%arg0: i32) -> (i32, i32, i32) {
    %c0_i32 = arith.constant 0 : i32
    %c0_i32_0 = arith.constant 0 : i32
    %c0_i32_1 = arith.constant 0 : i32
    return %c0_i32, %arg0, %c0_i32_0 : i32, i32, i32
  }
  func.func @transform_1(%arg0: i32) -> (i32, i32) {
    %c0_i32 = arith.constant 0 : i32
    %c0_i32_0 = arith.constant 0 : i32
    %c0_i32_1 = arith.constant 0 : i32
    return %c0_i32, %c0_i32_0 : i32, i32
  }
  func.func @transform_2(%arg0: i32) -> (i32, i32) {
    %c0_i32 = arith.constant 0 : i32
    %c0_i32_0 = arith.constant 0 : i32
    %c0_i32_1 = arith.constant 0 : i32
    return %c0_i32, %c0_i32_0 : i32, i32
  }
  func.func @transform_3(%arg0: i32) -> (i32, i32, i32) {
    %c0_i32 = arith.constant 0 : i32
    %c0_i32_0 = arith.constant 0 : i32
    %c0_i32_1 = arith.constant 0 : i32
    return %c0_i32, %arg0, %c0_i32_0 : i32, i32, i32
  }
}

module attributes {stable_mosaic.version = 11 : i64} {
  func.func @_linear_stats_kernel(%arg0: i32, %arg1: memref<64x128xbf16, #tpu.memory_space<vmem>>, %arg2: memref<128x128xbf16, #tpu.memory_space<vmem>>, %arg3: memref<1x128xf32, #tpu.memory_space<vmem>>, %arg4: memref<64x128xbf16, #tpu.memory_space<vmem>>, %arg5: memref<1x128xf32, #tpu.memory_space<vmem>>, %arg6: memref<1x128xf32, #tpu.memory_space<vmem>>) attributes {dimension_semantics = [#tpu.dimension_semantics<arbitrary>], iteration_bounds = array<i64: 1>, scalar_prefetch = 0 : i64, scratch_operands = 0 : i64, tpu.core_type = #tpu.core_type<tc>, window_params = [{transform_indices = @transform_0, window_bounds = array<i64: 64, 128>}, {pipeline_mode = #tpu.pipeline_mode<synchronous>, transform_indices = @transform_1, window_bounds = array<i64: 128, 128>}, {pipeline_mode = #tpu.pipeline_mode<synchronous>, transform_indices = @transform_2, window_bounds = array<i64: 1, 128>}, {transform_indices = @transform_3, window_bounds = array<i64: 64, 128>}, {pipeline_mode = #tpu.pipeline_mode<synchronous>, transform_indices = @transform_4, window_bounds = array<i64: 1, 128>}, {pipeline_mode = #tpu.pipeline_mode<synchronous>, transform_indices = @transform_5, window_bounds = array<i64: 1, 128>}]} {
    %c0 = arith.constant 0 : index
    %c0_0 = arith.constant 0 : index
    %0 = vector.load %arg1[%c0, %c0_0] : memref<64x128xbf16, #tpu.memory_space<vmem>>, vector<64x128xbf16>
    %c0_1 = arith.constant 0 : index
    %c0_2 = arith.constant 0 : index
    %1 = vector.load %arg2[%c0_1, %c0_2] : memref<128x128xbf16, #tpu.memory_space<vmem>>, vector<128x128xbf16>
    %cst = arith.constant dense<0.000000e+00> : vector<64x128xf32>
    %2 = tpu.matmul %0, %1, %cst {dimension_numbers = #tpu.dot_dimension_numbers<[1], [0], [0], [1], [0, 0, 1, 1], [], []>} : vector<64x128xbf16>, vector<128x128xbf16>, vector<64x128xf32> -> vector<64x128xf32>
    %c0_3 = arith.constant 0 : index
    %c0_4 = arith.constant 0 : index
    %3 = vector.load %arg3[%c0_3, %c0_4] : memref<1x128xf32, #tpu.memory_space<vmem>>, vector<1x128xf32>
    %4 = vector.broadcast %3 : vector<1x128xf32> to vector<64x128xf32>
    %5 = arith.addf %2, %4 : vector<64x128xf32>
    %6 = arith.truncf %5 : vector<64x128xf32> to vector<64x128xbf16>
    %c0_5 = arith.constant 0 : index
    %c0_6 = arith.constant 0 : index
    %7 = vector.load %arg4[%c0_5, %c0_6] : memref<64x128xbf16, #tpu.memory_space<vmem>>, vector<64x128xbf16>
    tpu.vector_store %arg4[%c0_5, %c0_6], %6 {strides = array<i32>} : memref<64x128xbf16, #tpu.memory_space<vmem>>, vector<64x128xbf16>,
    %c0_i32 = arith.constant 0 : i32
    %8 = arith.cmpi eq, %arg0, %c0_i32 : i32
    %9 = arith.extui %8 : i1 to i32
    %c0_i32_7 = arith.constant 0 : i32
    %10 = arith.cmpi ne, %9, %c0_i32_7 : i32
    scf.if %10 {
      %cst_18 = arith.constant 0.000000e+00 : f32
      %22 = vector.broadcast %cst_18 : f32 to vector<1x128xf32>
      %c0_19 = arith.constant 0 : index
      %c0_20 = arith.constant 0 : index
      %23 = vector.load %arg5[%c0_19, %c0_20] : memref<1x128xf32, #tpu.memory_space<vmem>>, vector<1x128xf32>
      tpu.vector_store %arg5[%c0_19, %c0_20], %22 {strides = array<i32>} : memref<1x128xf32, #tpu.memory_space<vmem>>, vector<1x128xf32>,
      %cst_21 = arith.constant 0.000000e+00 : f32
      %24 = vector.broadcast %cst_21 : f32 to vector<1x128xf32>
      %c0_22 = arith.constant 0 : index
      %c0_23 = arith.constant 0 : index
      %25 = vector.load %arg6[%c0_22, %c0_23] : memref<1x128xf32, #tpu.memory_space<vmem>>, vector<1x128xf32>
      tpu.vector_store %arg6[%c0_22, %c0_23], %24 {strides = array<i32>} : memref<1x128xf32, #tpu.memory_space<vmem>>, vector<1x128xf32>,
    } else {
    }
    %c0_8 = arith.constant 0 : index
    %c0_9 = arith.constant 0 : index
    %11 = vector.load %arg5[%c0_8, %c0_9] : memref<1x128xf32, #tpu.memory_space<vmem>>, vector<1x128xf32>
    %cst_10 = arith.constant dense<0.000000e+00> : vector<128xf32>
    %12 = vector.multi_reduction <add>, %5, %cst_10 [0] : vector<64x128xf32> to vector<128xf32>
    %13 = vector.shape_cast %12 : vector<128xf32> to vector<1x128xf32>
    %14 = arith.addf %11, %13 : vector<1x128xf32>
    %c0_11 = arith.constant 0 : index
    %c0_12 = arith.constant 0 : index
    %15 = vector.load %arg5[%c0_11, %c0_12] : memref<1x128xf32, #tpu.memory_space<vmem>>, vector<1x128xf32>
    tpu.vector_store %arg5[%c0_11, %c0_12], %14 {strides = array<i32>} : memref<1x128xf32, #tpu.memory_space<vmem>>, vector<1x128xf32>,
    %c0_13 = arith.constant 0 : index
    %c0_14 = arith.constant 0 : index
    %16 = vector.load %arg6[%c0_13, %c0_14] : memref<1x128xf32, #tpu.memory_space<vmem>>, vector<1x128xf32>
    %17 = arith.mulf %5, %5 : vector<64x128xf32>
    %cst_15 = arith.constant dense<0.000000e+00> : vector<128xf32>
    %18 = vector.multi_reduction <add>, %17, %cst_15 [0] : vector<64x128xf32> to vector<128xf32>
    %19 = vector.shape_cast %18 : vector<128xf32> to vector<1x128xf32>
    %20 = arith.addf %16, %19 : vector<1x128xf32>
    %c0_16 = arith.constant 0 : index
    %c0_17 = arith.constant 0 : index
    %21 = vector.load %arg6[%c0_16, %c0_17] : memref<1x128xf32, #tpu.memory_space<vmem>>, vector<1x128xf32>
    tpu.vector_store %arg6[%c0_16, %c0_17], %20 {strides = array<i32>} : memref<1x128xf32, #tpu.memory_space<vmem>>, vector<1x128xf32>,
    return
  }
  func.func @transform_0(%arg0: i32) -> (i32, i32) {
    %c0_i32 = arith.constant 0 : i32
    %c0_i32_0 = arith.constant 0 : i32
    return %arg0, %c0_i32 : i32, i32
  }
  func.func @transform_1(%arg0: i32) -> (i32, i32) {
    %c0_i32 = arith.constant 0 : i32
    %c0_i32_0 = arith.constant 0 : i32
    %c0_i32_1 = arith.constant 0 : i32
    return %c0_i32, %c0_i32_0 : i32, i32
  }
  func.func @transform_2(%arg0: i32) -> (i32, i32) {
    %c0_i32 = arith.constant 0 : i32
    %c0_i32_0 = arith.constant 0 : i32
    %c0_i32_1 = arith.constant 0 : i32
    return %c0_i32, %c0_i32_0 : i32, i32
  }
  func.func @transform_3(%arg0: i32) -> (i32, i32) {
    %c0_i32 = arith.constant 0 : i32
    %c0_i32_0 = arith.constant 0 : i32
    return %arg0, %c0_i32 : i32, i32
  }
  func.func @transform_4(%arg0: i32) -> (i32, i32) {
    %c0_i32 = arith.constant 0 : i32
    %c0_i32_0 = arith.constant 0 : i32
    %c0_i32_1 = arith.constant 0 : i32
    return %c0_i32, %c0_i32_0 : i32, i32
  }
  func.func @transform_5(%arg0: i32) -> (i32, i32) {
    %c0_i32 = arith.constant 0 : i32
    %c0_i32_0 = arith.constant 0 : i32
    %c0_i32_1 = arith.constant 0 : i32
    return %c0_i32, %c0_i32_0 : i32, i32
  }
}

</mosaic_0001>

<bundles_post_ra>
// kernel: mlp_forward.4
= control target key start
LH: loop header
LB: loop body
LE: loop exit
PB: predicated region body
PF: predicated region fallthrough
CT: control target
= control target key end

     0   :  { %v401_v12 = vmov 0.0   ;;  %s501_s1 = inlined_call_operand.vmem [shape: bf16[128,128], index: 1, kind: input, shape index: {}]   ;;  %s502_s0 = inlined_call_operand.vmem [shape: bf16[64,128], index: 0, kind: input, shape index: {}]   ;;  %s503_s4 = inlined_call_operand.vmem [shape: f32[1,128], index: 4, kind: output, shape index: {1}]   ;;  %s504_s5 = inlined_call_operand.vmem [shape: f32[1,128], index: 5, kind: output, shape index: {2}]   ;;  %s505_s2 = inlined_call_operand.vmem [shape: f32[1,128], index: 2, kind: input, shape index: {}]   ;;  %s506_s3 = inlined_call_operand.vmem [shape: bf16[64,128], index: 3, kind: output, shape index: {0}]  }
   0x1   :  { %v389_v0 = vld [vmem:[%s501_s1] sm:$0xff]   ;;  %v390_v1 = vld [vmem:[%s501_s1 + $0x8] sm:$0xff]   ;;  %v391_v2 = vld [vmem:[%s501_s1 + $0x10] sm:$0xff]   ;;  %230 = vst [vmem:[%s503_s4] sm:$0x1] %v401_v12 }
   0x2   :  { %348 = vmatprep.subr.bf16.mxu0 %v389_v0  ;;  %372 = vmatprep.subr.bf16.mxu1 %v389_v0  ;;  %v392_v3 = vld [vmem:[%s501_s1 + $0x18] sm:$0xff]   ;;  %v397_v4 = vld [vmem:[%s502_s0] sm:$0xff]   ;;  %v399_v5 = vld [vmem:[%s502_s0 + $0x10] sm:$0xff]   ;;  %231 = vst [vmem:[%s504_s5] sm:$0x1] %v401_v12 }
   0x3   :  { %349 = vmatpush3.bf16.msra.mxu0 %v389_v0  ;;  %380 = vmatpush3.bf16.msra.mxu1 %v389_v0  ;;  %v393_v6 = vld [vmem:[%s501_s1 + $0x20] sm:$0xff]   ;;  %v394_v7 = vld [vmem:[%s501_s1 + $0x28] sm:$0xff]   ;;  %v395_v8 = vld [vmem:[%s501_s1 + $0x30] sm:$0xff]  }
   0x4   :  { %350 = vmatprep.subr.bf16.mxu0 %v390_v1  ;;  %373 = vmatprep.subr.bf16.mxu1 %v390_v1  ;;  %v396_v9 = vld [vmem:[%s501_s1 + $0x38] sm:$0xff]   ;;  %v398_v10 = vld [vmem:[%s502_s0 + $0x8] sm:$0xff]   ;;  %v284_v13 = vld [vmem:[%s505_s2] ss:$0 sm:$0xff] }
   0x5   :  { %364 = vmatprep.mubr.bf16.mxu0 %v397_v4  ;;  %368 = vmatprep.mubr.bf16.mxu1 %v399_v5  ;;  %v400_v11 = vld [vmem:[%s502_s0 + $0x18] sm:$0xff]  }
   0x7   :  { %351 = vmatpush3.bf16.msra.mxu0 %v390_v1  ;;  %381 = vmatpush3.bf16.msra.mxu1 %v390_v1 }
   0x8   :  { %352 = vmatprep.subr.bf16.mxu0 %v391_v2  ;;  %374 = vmatprep.subr.bf16.mxu1 %v391_v2  ;;  %v232_v1 = vld [vmem:[%s503_s4] sm:$0x1] }
   0x9   :  { %v248_v4 = vld [vmem:[%s504_s5] sm:$0x1] }
   0xb   :  { %353 = vmatpush3.bf16.msra.mxu0 %v391_v2  ;;  %382 = vmatpush3.bf16.msra.mxu1 %v391_v2 }
   0xc   :  { %354 = vmatprep.subr.bf16.mxu0 %v392_v3  ;;  %375 = vmatprep.subr.bf16.mxu1 %v392_v3 }
   0xf   :  { %355 = vmatpush3.bf16.msra.mxu0 %v392_v3  ;;  %383 = vmatpush3.bf16.msra.mxu1 %v392_v3 }
  0x10   :  { %356 = vmatprep.subr.bf16.mxu0 %v393_v6  ;;  %376 = vmatprep.subr.bf16.mxu1 %v393_v6 }
  0x13   :  { %357 = vmatpush3.bf16.msra.mxu0 %v393_v6  ;;  %384 = vmatpush3.bf16.msra.mxu1 %v393_v6 }
  0x14   :  { %358 = vmatprep.subr.bf16.mxu0 %v394_v7  ;;  %377 = vmatprep.subr.bf16.mxu1 %v394_v7 }
  0x17   :  { %359 = vmatpush3.bf16.msra.mxu0 %v394_v7  ;;  %385 = vmatpush3.bf16.msra.mxu1 %v394_v7 }
  0x18   :  { %360 = vmatprep.subr.bf16.mxu0 %v395_v8  ;;  %378 = vmatprep.subr.bf16.mxu1 %v395_v8 }
  0x1b   :  { %361 = vmatpush3.bf16.msra.mxu0 %v395_v8  ;;  %386 = vmatpush3.bf16.msra.mxu1 %v395_v8 }
  0x1c   :  { %362 = vmatprep.subr.bf16.mxu0 %v396_v9  ;;  %379 = vmatprep.subr.bf16.mxu1 %v396_v9 }
  0x1f   :  { %363 = vmatpush3.bf16.msra.mxu0 %v396_v9  ;;  %387 = vmatpush3.bf16.msra.mxu1 %v396_v9 }
  0x22   :  { %365 = vmatmul.mubr.bf16.vlgmr.msra.gmra.mrb[0].mxu0 %v398_v10  ;;  %369 = vmatmul.mubr.bf16.vlgmr.msra.gmra.mrb[0].mxu1 %v400_v11 }
  0xf5   :  { %v366_v14 = vpop.f32.mrb[0].mxu0  ;;  %v370_v15 = vpop.f32.mrb[0].mxu1 }
  0xf6   :  { %v155_v16 = vpop.f32.mrb[1].mxu0  ;;  %v180_v17 = vadd.f32 %v370_v15, %v284_v13  ;;  %v171_v18 = vpop.f32.mrb[1].mxu1  ;;  %v164_v23 = vadd.f32 %v366_v14, %v284_v13 }
  0xf7   :  { %v156_v19 = vadd.f32 %v284_v13, %v155_v16  ;;  %v367_v20 = vpop.f32.mrb[2].mxu0  ;;  %v172_v21 = vadd.f32 %v284_v13, %v171_v18  ;;  %v371_v22 = vpop.f32.mrb[2].mxu1 }
  0xf8   :  { %v167_v24 = vadd.f32 %v367_v20, %v284_v13  ;;  %v158_v25 = vpop.f32.mrb[3].mxu0  ;;  %v183_v26 = vadd.f32 %v371_v22, %v284_v13  ;;  %v174_v27 = vpop.f32.mrb[3].mxu1  ;;  %v251_v37 = vmul.f32 %v164_v23, %v164_v23  ;;  %v255_v49 = vmul.f32 %v180_v17, %v180_v17 }
  0xf9   :  { %v159_v28 = vadd.f32 %v284_v13, %v158_v25  ;;  %v175_v29 = vadd.f32 %v284_v13, %v174_v27  ;;  %v249_v30 = vmul.f32 %v156_v19, %v156_v19  ;;  %v253_v43 = vmul.f32 %v172_v21, %v172_v21 }
  0xfa   :  { %v321_v31 = vpack.c.bf16 %v167_v24, %v164_v23  ;;  %v331_v32 = vpack.c.bf16 %v183_v26, %v180_v17  ;;  %v252_v40 = vmul.f32 %v167_v24, %v167_v24  ;;  %v256_v52 = vmul.f32 %v183_v26, %v183_v26 }
  0xfb   :  { %v316_v33 = vpack.c.bf16 %v159_v28, %v156_v19  ;;  %v233_v34 = vadd.f32 %v159_v28, %v156_v19  ;;  %v250_v35 = vmul.f32 %v159_v28, %v159_v28  ;;  %v326_v36 = vpack.c.bf16 %v175_v29, %v172_v21 }
  0xfc   :  { %333 = vst [vmem:[%s506_s3 + $0x8] sm:$0xff] %v321_v31   ;;  %335 = vst [vmem:[%s506_s3 + $0x18] sm:$0xff] %v331_v32   ;;  %v254_v48 = vmul.f32 %v175_v29, %v175_v29 }
  0xfd   :  { %317 = vst [vmem:[%s506_s3] sm:$0xff] %v316_v33   ;;  %v234_v38 = vadd.f32 %v233_v34, %v164_v23  ;;  %v257_v39 = vadd.f32 %v250_v35, %v249_v30  ;;  %334 = vst [vmem:[%s506_s3 + $0x10] sm:$0xff] %v326_v36  }
  0xff   :  { %v258_v41 = vadd.f32 %v257_v39, %v251_v37  ;;  %v235_v42 = vadd.f32 %v234_v38, %v167_v24 }
 0x101   :  { %v236_v44 = vadd.f32 %v235_v42, %v172_v21  ;;  %v259_v45 = vadd.f32 %v258_v41, %v252_v40 }
 0x103   :  { %v260_v46 = vadd.f32 %v259_v45, %v253_v43  ;;  %v237_v47 = vadd.f32 %v236_v44, %v175_v29 }
 0x105   :  { %v238_v50 = vadd.f32 %v237_v47, %v180_v17  ;;  %v261_v51 = vadd.f32 %v260_v46, %v254_v48 }
 0x107   :  { %v239_v53 = vadd.f32 %v238_v50, %v183_v26  ;;  %v262_v54 = vadd.f32 %v261_v51, %v255_v49 }
 0x109   :  { %v240_v55 = vrot.slane %v239_v53, 4  ;;  %v263_v56 = vadd.f32 %v262_v54, %v256_v52 }
 0x10b   :  { %v241_v57 = vadd.f32 %v240_v55, %v239_v53  ;;  %v264_v58 = vrot.slane %v263_v56, 4 }
 0x10d   :  { %v242_v59 = vrot.slane %v241_v57, 2  ;;  %v265_v60 = vadd.f32 %v264_v58, %v263_v56 }
 0x10f   :  { %v243_v61 = vadd.f32 %v242_v59, %v241_v57  ;;  %v266_v62 = vrot.slane %v265_v60, 2 }
 0x111   :  { %v244_v63 = vrot.slane %v243_v61, 1  ;;  %v267_v0 = vadd.f32 %v266_v62, %v265_v60 }
 0x113   :  { %v245_v2 = vadd.f32 %v244_v63, %v243_v61  ;;  %v268_v3 = vrot.slane %v267_v0, 1 }
 0x115   :  { %v246_v5 = vadd.f32 %v245_v2, %v232_v1  ;;  %v269_v6 = vadd.f32 %v268_v3, %v267_v0 }
 0x117   :  { %247 = vst [vmem:[%s503_s4] sm:$0x1] %v246_v5  ;;  %v270_v7 = vadd.f32 %v269_v6, %v248_v4 }
 0x119   :  { %271 = vst [vmem:[%s504_s5] sm:$0x1] %v270_v7 }

// kernel: mlp_forward.5
= control target key start
LH: loop header
LB: loop body
LE: loop exit
PB: predicated region body
PF: predicated region fallthrough
CT: control target
= control target key end

     0   :  { %v241_v16 = vmov 0.0   ;;  %s320_s0 = inlined_call_operand.vmem [shape: bf16[4,16,128], index: 0, kind: input, shape index: {}]   ;;  %s321_s1 = inlined_call_operand.vmem [shape: f32[1,128], index: 1, kind: input, shape index: {}]   ;;  %s322_s2 = inlined_call_operand.vmem [shape: f32[1,128], index: 2, kind: input, shape index: {}]   ;;  %s323_s3 = inlined_call_operand.vmem [shape: bf16[4,16,128], index: 3, kind: output, shape index: {}]  }
   0x1   :  { %v265_v0 = vld [vmem:[%s321_s1] ss:$0 sm:$0xff]  ;;  %v234_v4 = vld [vmem:[%s320_s0 + $0x8] sm:$0xff]   ;;  %v236_v24 = vld [vmem:[%s320_s0 + $0x10] sm:$0xff]  }
   0x2   :  { %v207_v1 = vld [vmem:[%s320_s0] sm:$0xff]   ;;  %v215_v6 = vunpack.c.l.bf16 %v234_v4  ;;  %v216_v9 = vunpack.c.h.bf16 %v234_v4  ;;  %v222_v27 = vunpack.c.l.bf16 %v236_v24  ;;  %v223_v30 = vunpack.c.h.bf16 %v236_v24  ;;  %v238_v44 = vld [vmem:[%s320_s0 + $0x18] sm:$0xff]  }
   0x3   :  { %v208_v2 = vunpack.c.l.bf16 %v207_v1  ;;  %v209_v3 = vunpack.c.h.bf16 %v207_v1  ;;  %v276_v5 = vld [vmem:[%s322_s2] ss:$0 sm:$0xff]  ;;  %v229_v47 = vunpack.c.l.bf16 %v238_v44  ;;  %v230_v50 = vunpack.c.h.bf16 %v238_v44 }
   0x4   :  { %v65_v12 = vmul.f32 %v215_v6, %v265_v0  ;;  %v66_v15 = vmul.f32 %v216_v9, %v265_v0  ;;  %v101_v33 = vmul.f32 %v222_v27, %v265_v0  ;;  %v102_v36 = vmul.f32 %v223_v30, %v265_v0 }
   0x5   :  { %v26_v7 = vmul.f32 %v208_v2, %v265_v0  ;;  %v27_v8 = vmul.f32 %v209_v3, %v265_v0  ;;  %v137_v53 = vmul.f32 %v229_v47, %v265_v0  ;;  %v138_v56 = vmul.f32 %v230_v50, %v265_v0 }
   0x6   :  { %v67_v19 = vadd.f32 %v276_v5, %v65_v12  ;;  %v68_v23 = vadd.f32 %v276_v5, %v66_v15  ;;  %v103_v39 = vadd.f32 %v276_v5, %v101_v33  ;;  %v104_v43 = vadd.f32 %v276_v5, %v102_v36 }
   0x7   :  { %v34_v10 = vadd.f32 %v276_v5, %v26_v7  ;;  %v35_v11 = vadd.f32 %v276_v5, %v27_v8  ;;  %v139_v59 = vadd.f32 %v276_v5, %v137_v53  ;;  %v140_v63 = vadd.f32 %v276_v5, %v138_v56 }
   0x9   :  { %v36_v13 = vmul.f32 0.5, %v34_v10  ;;  %v37_v14 = vmul.f32 0.5, %v35_v11 }
   0xb   :  { %vm40_vm0 = vcmp.ge.f32.partialorder %v36_v13, 1.0  ;;  %vm41_vm1 = vcmp.ge.f32.partialorder %v37_v14, 1.0 }
   0xc   :  { %v170_v17 = vsel %vm40_vm0, 1.0, %v241_v16  ;;  %v171_v18 = vsel %vm41_vm1, 1.0, %v241_v16 }
   0xd   :  { %v46_v20 = vsub.f32 1.0, %v170_v17  ;;  %v47_v21 = vsub.f32 1.0, %v171_v18  ;;  %v211_v22 = vpack.c.bf16 %v171_v18, %v170_v17 }
   0xf   :  { %v48_v25 = vmul.f32 %v46_v20, %v36_v13  ;;  %v49_v26 = vmul.f32 %v47_v21, %v37_v14  ;;  %212 = vst [vmem:[%s323_s3] sm:$0xff] %v211_v22  }
  0x11   :  { %v69_v28 = vsub.f32 %v67_v19, %v48_v25  ;;  %v70_v29 = vsub.f32 %v68_v23, %v49_v26 }
  0x13   :  { %v71_v31 = vmul.f32 0.5, %v69_v28  ;;  %v72_v32 = vmul.f32 0.5, %v70_v29 }
  0x15   :  { %v73_v34 = vadd.f32 %v71_v31, %v48_v25  ;;  %v74_v35 = vadd.f32 %v72_v32, %v49_v26 }
  0x17   :  { %vm75_vm2 = vcmp.ge.f32.partialorder %v73_v34, 1.0  ;;  %vm76_vm3 = vcmp.ge.f32.partialorder %v74_v35, 1.0 }
  0x18   :  { %v176_v37 = vsel %vm75_vm2, 1.0, %v241_v16  ;;  %v177_v38 = vsel %vm76_vm3, 1.0, %v241_v16 }
  0x19   :  { %v81_v40 = vsub.f32 1.0, %v176_v37  ;;  %v82_v41 = vsub.f32 1.0, %v177_v38  ;;  %v218_v42 = vpack.c.bf16 %v177_v38, %v176_v37 }
  0x1b   :  { %v83_v45 = vmul.f32 %v81_v40, %v73_v34  ;;  %v84_v46 = vmul.f32 %v82_v41, %v74_v35  ;;  %235 = vst [vmem:[%s323_s3 + $0x8] sm:$0xff] %v218_v42  }
  0x1d   :  { %v105_v48 = vsub.f32 %v103_v39, %v83_v45  ;;  %v106_v49 = vsub.f32 %v104_v43, %v84_v46 }
  0x1f   :  { %v107_v51 = vmul.f32 0.5, %v105_v48  ;;  %v108_v52 = vmul.f32 0.5, %v106_v49 }
  0x21   :  { %v109_v54 = vadd.f32 %v107_v51, %v83_v45  ;;  %v110_v55 = vadd.f32 %v108_v52, %v84_v46 }
  0x23   :  { %vm111_vm4 = vcmp.ge.f32.partialorder %v109_v54, 1.0  ;;  %vm112_vm5 = vcmp.ge.f32.partialorder %v110_v55, 1.0 }
  0x24   :  { %v184_v57 = vsel %vm111_vm4, 1.0, %v241_v16  ;;  %v185_v58 = vsel %vm112_vm5, 1.0, %v241_v16 }
  0x25   :  { %v117_v60 = vsub.f32 1.0, %v184_v57  ;;  %v118_v61 = vsub.f32 1.0, %v185_v58  ;;  %v225_v62 = vpack.c.bf16 %v185_v58, %v184_v57 }
  0x27   :  { %v119_v1 = vmul.f32 %v117_v60, %v109_v54  ;;  %v120_v2 = vmul.f32 %v118_v61, %v110_v55  ;;  %237 = vst [vmem:[%s323_s3 + $0x10] sm:$0xff] %v225_v62  }
  0x29   :  { %v141_v0 = vsub.f32 %v139_v59, %v119_v1  ;;  %v142_v3 = vsub.f32 %v140_v63, %v120_v2 }
  0x2b   :  { %v143_v4 = vmul.f32 0.5, %v141_v0  ;;  %v144_v6 = vmul.f32 0.5, %v142_v3 }
  0x2d   :  { %v145_v7 = vadd.f32 %v143_v4, %v119_v1  ;;  %v146_v8 = vadd.f32 %v144_v6, %v120_v2 }
  0x2f   :  { %vm147_vm6 = vcmp.ge.f32.partialorder %v145_v7, 1.0  ;;  %vm148_vm7 = vcmp.ge.f32.partialorder %v146_v8, 1.0 }
  0x30   :  { %v192_v9 = vsel %vm147_vm6, 1.0, %v241_v16  ;;  %v193_v10 = vsel %vm148_vm7, 1.0, %v241_v16 }
  0x31   :  { %v232_v11 = vpack.c.bf16 %v193_v10, %v192_v9 }
  0x33   :  { %239 = vst [vmem:[%s323_s3 + $0x18] sm:$0xff] %v232_v11  }

</bundles_post_ra>
